<compile_context>
chip_gen: v7x
topology: tpu7x:2x2x1
jax: 0.10.0
libtpu: 0.0.40
codegen_flags: <defaults>
</compile_context>

<pallas_src>
import functools

import jax
import jax.numpy as jnp
from jax.experimental import pallas as pl
from jax.experimental.pallas import tpu as pltpu


def _round_up(n, m):
    return ((n + m - 1) // m) * m


def dpp_shared_g_kernel(x_ref, wcat_ref, bcat_ref, out_ref, *, f_out_p):
    """One batch tile of the fully fused DPPLayer_SharedG forward.

    x_ref    : [TB, F_in]          (input dtype; cast to bf16 in-kernel)
    wcat_ref : [F_in, 3*F_out_p]   (bf16) = [ (W_a-W_b)^T | W_b^T | W_gs^T @ W_gu^T ]
    bcat_ref : [1,    3*F_out_p]   (f32)  = [ b_a-b_b | b_b | b_gs @ W_gu^T + b_gu ]
    out_ref  : [TB,   F_out_p]     (x dtype, lane-dense 128-padded width)
    """
    # In-kernel f32 -> bf16 cast (avoids a separate wrapper-side cast pass).
    x = x_ref[...].astype(wcat_ref.dtype)

    # One wide MXU pass for all three (now fused) linears, f32 accumulation,
    # single broadcast bias add.
    h = jnp.dot(x, wcat_ref[...], preferred_element_type=jnp.float32) + bcat_ref[...]

    # 128-aligned static slices of the fused result.
    z_d = h[:, :f_out_p]                     # z_a - z_b
    z_b = h[:, f_out_p:2 * f_out_p]
    g_logits = h[:, 2 * f_out_p:]            # pre-fused gating logits

    alpha = jax.nn.sigmoid(g_logits)         # EUP
    out_ref[...] = (z_b + alpha * z_d).astype(out_ref.dtype)


def prepare_params(params, compute_dtype=jnp.bfloat16):
    """One-time (off the hot path) algebraic folding + layout prep.

    Folds (valid because the g_shared -> g_unit chain is purely linear):
      W_g_fused = W_g_shared^T @ W_g_unit^T ,  b_g_fused = b_g_shared @ W_g_unit^T + b_g_unit
      W_d = W_a - W_b ,                        b_d = b_a - b_b
    then lane-pads every segment to a multiple of 128 and concatenates into a
    single [F_in, 3*F_out_p] bf16 matrix + [1, 3*F_out_p] f32 bias row.
    Padded columns are zero -> inert -> sliced away in the wrapper.
    """
    f_out, f_in = params["w_a"].shape
    f_out_p = _round_up(f_out, 128)

    # Fold the gating chain in f32, then cast once to bf16.
    w_gs_t = params["w_g_shared"].T.astype(jnp.float32)          # [F_in, G]
    w_gu_t = params["w_g_unit"].T.astype(jnp.float32)            # [G, F_out]
    w_g_fused = w_gs_t @ w_gu_t                                  # [F_in, F_out]
    b_g_fused = params["b_g_shared"].astype(jnp.float32) @ w_gu_t + params["b_g_unit"]

    w_d_t = (params["w_a"] - params["w_b"]).T.astype(jnp.float32)  # [F_in, F_out]
    b_d = (params["b_a"] - params["b_b"]).astype(jnp.float32)

    def pad_cols(w):                                             # [F_in, n] -> [F_in, F_out_p]
        return jnp.pad(w, ((0, 0), (0, f_out_p - w.shape[1])))

    def pad_bias(b):
        return jnp.pad(b, (0, f_out_p - b.shape[0]))

    w_cat = jnp.concatenate(
        [pad_cols(w_d_t), pad_cols(params["w_b"].T.astype(jnp.float32)), pad_cols(w_g_fused)],
        axis=1).astype(compute_dtype)                            # [F_in, 3*F_out_p] bf16

    b_cat = jnp.concatenate(
        [pad_bias(b_d), pad_bias(params["b_b"].astype(jnp.float32)), pad_bias(b_g_fused)]
    ).reshape(1, 3 * f_out_p).astype(jnp.float32)

    return {
        "w_cat": w_cat, "b_cat": b_cat,
        "f_in": f_in, "f_out": f_out, "f_out_p": f_out_p,
        "compute_dtype": compute_dtype,
    }


def dpp_shared_g_forward(x, prep, block_rows=None):
    """Runs the fused Pallas kernel over a row-parallel batch grid and slices
    the lane padding back off.  Output dtype == x dtype (module semantics); to
    get a bf16 result for a bf16 consumer, pass bf16 x."""
    B, F_in = x.shape
    assert F_in == prep["f_in"]
    f_out, f_out_p = prep["f_out"], prep["f_out_p"]
    n_cat = 3 * f_out_p
    out_dtype = x.dtype

    # --- Batch tile selection -------------------------------------------------
    if block_rows is None:
        block_rows = 512                  # multiple of 256 (v6e/v7x MXU-M) and 128 (v5e)
    if B > 16:
        # Keep >= 2 grid steps so both v7x TensorCores get work.
        block_rows = min(block_rows, _round_up(pl.cdiv(B, 2), 16))
    block_rows = max(16, _round_up(min(block_rows, _round_up(B, 16)), 16))

    grid = (pl.cdiv(B, block_rows),)      # no explicit batch pad; ragged last block is fine
                                          # (rows are independent, OOB output rows are dropped)

    # --- VMEM budget (double-buffered x/out tiles, resident weights, f32 h) ----
    in_bytes = jnp.dtype(x.dtype).itemsize
    out_bytes = jnp.dtype(out_dtype).itemsize
    w_bytes = jnp.dtype(prep["compute_dtype"]).itemsize
    vmem_needed = (2 * block_rows * F_in * in_bytes            # x tiles (double-buffered)
                   + 2 * block_rows * f_out_p * out_bytes      # out tiles
                   + 2 * (F_in * n_cat * w_bytes + n_cat * 4)  # weights + bias (worst case 2x)
                   + 2 * block_rows * n_cat * 4)               # f32 intermediate h + slack
    vmem_limit = int(min(max(2 * vmem_needed, 8 << 20), 48 << 20))  # safe on v7x (64 MiB VMEM)

    cost = pl.CostEstimate(
        flops=2 * B * F_in * n_cat + 3 * B * f_out_p,
        transcendentals=B * f_out_p,
        bytes_accessed=(B * F_in * in_bytes + F_in * n_cat * w_bytes
                        + n_cat * 4 + B * f_out_p * out_bytes),
    )

    kernel = functools.partial(dpp_shared_g_kernel, f_out_p=f_out_p)

    def run(single_buffer_weights):
        if single_buffer_weights:
            # Constant index_map -> no need to double-buffer the resident blocks.
            w_spec = pl.BlockSpec((F_in, n_cat), lambda i: (0, 0),
                                  pipeline_mode=pl.Buffered(1))
            b_spec = pl.BlockSpec((1, n_cat), lambda i: (0, 0),
                                  pipeline_mode=pl.Buffered(1))
        else:
            w_spec = pl.BlockSpec((F_in, n_cat), lambda i: (0, 0))
            b_spec = pl.BlockSpec((1, n_cat), lambda i: (0, 0))
        return pl.pallas_call(
            kernel,
            out_shape=jax.ShapeDtypeStruct((B, f_out_p), out_dtype),
            grid=grid,
            in_specs=[
                pl.BlockSpec((block_rows, F_in), lambda i: (i, 0)),  # x: tiled rows
                w_spec,                                              # fused W (resident)
                b_spec,                                              # fused bias (resident)
            ],
            out_specs=pl.BlockSpec((block_rows, f_out_p), lambda i: (i, 0)),
            compiler_params=pltpu.CompilerParams(
                dimension_semantics=("parallel",),
                vmem_limit_bytes=vmem_limit,
            ),
            cost_estimate=cost,
        )(x, prep["w_cat"], prep["b_cat"])

    try:
        out_p = run(True)
    except Exception:
        # Fallback for JAX builds that reject single-buffered resident blocks.
        out_p = run(False)

    return out_p[:, :f_out]


def init_params(key, input_features, output_features, shared_g_dim):
    """Deterministic init mimicking PyTorch kaiming_uniform_(a=sqrt(5)) +
    uniform bias (shapes match the nn.Module exactly)."""
    ks = jax.random.split(key, 8)

    def kaiming_uniform(k, shape):
        fan_in = shape[1]
        gain = (2.0 / (1.0 + 5.0)) ** 0.5
        bound = gain * (3.0 / fan_in) ** 0.5
        return jax.random.uniform(k, shape, jnp.float32, -bound, bound)

    def bias_uniform(k, fan_in, n):
        bound = 1.0 / fan_in ** 0.5
        return jax.random.uniform(k, (n,), jnp.float32, -bound, bound)

    return {
        "w_a": kaiming_uniform(ks[0], (output_features, input_features)),
        "b_a": bias_uniform(ks[1], input_features, output_features),
        "w_b": kaiming_uniform(ks[2], (output_features, input_features)),
        "b_b": bias_uniform(ks[3], input_features, output_features),
        "w_g_shared": kaiming_uniform(ks[4], (shared_g_dim, input_features)),
        "b_g_shared": bias_uniform(ks[5], input_features, shared_g_dim),
        "w_g_unit": kaiming_uniform(ks[6], (output_features, shared_g_dim)),
        "b_g_unit": bias_uniform(ks[7], shared_g_dim, output_features),
    }


def reference_forward(x, p):
    """Pure-JAX f32 reference replicating the PyTorch forward exactly."""
    z_a = x @ p["w_a"].T + p["b_a"]
    z_b = x @ p["w_b"].T + p["b_b"]
    x_g = x @ p["w_g_shared"].T + p["b_g_shared"]
    g_logits = x_g @ p["w_g_unit"].T + p["b_g_unit"]
    alpha = jax.nn.sigmoid(g_logits)
    return alpha * z_a + (1.0 - alpha) * z_b


if __name__ == "__main__":
    # TODO(synk): return_alpha=True path is not emitted as a second output; only
    # the default forward return (z_final) is implemented.
    B, F_IN, F_OUT, G_DIM = 64, 32, 16, 8

    key = jax.random.PRNGKey(0)
    k_x, k_p = jax.random.split(key)
    x = jax.random.normal(k_x, (B, F_IN), jnp.float32)
    params = init_params(k_p, F_IN, F_OUT, G_DIM)

    prep = prepare_params(params, compute_dtype=jnp.bfloat16)

    out = dpp_shared_g_forward(x, prep)          # block_rows auto -> 32, 2 grid steps
    out = jax.block_until_ready(out)
    assert out.shape == (B, F_OUT)
    assert out.dtype == x.dtype

    # Check against the full-f32 PyTorch-equivalent forward (kernel uses bf16
    # matmul inputs with f32 accumulation, so tolerance is a few e-3).
    ref = reference_forward(x, params)
    assert jnp.allclose(out, ref, atol=3e-2, rtol=3e-2), "mismatch vs f32 reference"

    print("KERNEL_OK")
</pallas_src>

<mosaic_0001>
module attributes {stable_mosaic.version = 11 : i64} {
  func.func @dpp_shared_g_kernel(%arg0: i32, %arg1: memref<32x32xf32, #tpu.memory_space<vmem>>, %arg2: memref<32x384xbf16, #tpu.memory_space<vmem>>, %arg3: memref<1x384xf32, #tpu.memory_space<vmem>>, %arg4: memref<32x128xf32, #tpu.memory_space<vmem>>) attributes {dimension_semantics = [#tpu.dimension_semantics<parallel>], iteration_bounds = array<i64: 2>, scalar_prefetch = 0 : i64, scratch_operands = 0 : i64, tpu.core_type = #tpu.core_type<tc>, window_params = [{transform_indices = @transform_0, window_bounds = array<i64: 32, 32>}, {pipeline_mode = #tpu.pipeline_mode<synchronous>, transform_indices = @transform_1, window_bounds = array<i64: 32, 384>}, {pipeline_mode = #tpu.pipeline_mode<synchronous>, transform_indices = @transform_2, window_bounds = array<i64: 1, 384>}, {transform_indices = @transform_3, window_bounds = array<i64: 32, 128>}]} {
    %c0 = arith.constant 0 : index
    %c0_0 = arith.constant 0 : index
    %0 = vector.load %arg1[%c0, %c0_0] : memref<32x32xf32, #tpu.memory_space<vmem>>, vector<32x32xf32>
    %1 = arith.truncf %0 : vector<32x32xf32> to vector<32x32xbf16>
    %c0_1 = arith.constant 0 : index
    %c0_2 = arith.constant 0 : index
    %2 = vector.load %arg2[%c0_1, %c0_2] : memref<32x384xbf16, #tpu.memory_space<vmem>>, vector<32x384xbf16>
    %cst = arith.constant dense<0.000000e+00> : vector<32x384xf32>
    %3 = tpu.matmul %1, %2, %cst {dimension_numbers = #tpu.dot_dimension_numbers<[1], [0], [0], [1], [0, 0, 1, 1], [], []>} : vector<32x32xbf16>, vector<32x384xbf16>, vector<32x384xf32> -> vector<32x384xf32>
    %c0_3 = arith.constant 0 : index
    %c0_4 = arith.constant 0 : index
    %4 = vector.load %arg3[%c0_3, %c0_4] : memref<1x384xf32, #tpu.memory_space<vmem>>, vector<1x384xf32>
    %5 = vector.broadcast %4 : vector<1x384xf32> to vector<32x384xf32>
    %6 = arith.addf %3, %5 : vector<32x384xf32>
    %7 = vector.extract_strided_slice %6 {offsets = [0, 0], sizes = [32, 128], strides = [1, 1]} : vector<32x384xf32> to vector<32x128xf32>
    %8 = vector.extract_strided_slice %6 {offsets = [0, 128], sizes = [32, 128], strides = [1, 1]} : vector<32x384xf32> to vector<32x128xf32>
    %9 = vector.extract_strided_slice %6 {offsets = [0, 256], sizes = [32, 128], strides = [1, 1]} : vector<32x384xf32> to vector<32x128xf32>
    %10 = arith.negf %9 : vector<32x128xf32>
    %11 = math.exp %10 : vector<32x128xf32>
    %cst_5 = arith.constant 1.000000e+00 : f32
    %12 = vector.broadcast %cst_5 : f32 to vector<32x128xf32>
    %13 = arith.addf %12, %11 : vector<32x128xf32>
    %14 = arith.divf %12, %13 : vector<32x128xf32>
    %15 = arith.mulf %14, %7 : vector<32x128xf32>
    %16 = arith.addf %8, %15 : vector<32x128xf32>
    %c0_6 = arith.constant 0 : index
    %c0_7 = arith.constant 0 : index
    %17 = vector.load %arg4[%c0_6, %c0_7] : memref<32x128xf32, #tpu.memory_space<vmem>>, vector<32x128xf32>
    tpu.vector_store %arg4[%c0_6, %c0_7], %16 {strides = array<i32>} : memref<32x128xf32, #tpu.memory_space<vmem>>, vector<32x128xf32>,
    return
  }
  func.func @transform_0(%arg0: i32) -> (i32, i32) {
    %c0_i32 = arith.constant 0 : i32
    %c0_i32_0 = arith.constant 0 : i32
    return %arg0, %c0_i32 : i32, i32
  }
  func.func @transform_1(%arg0: i32) -> (i32, i32) {
    %c0_i32 = arith.constant 0 : i32
    %c0_i32_0 = arith.constant 0 : i32
    %c0_i32_1 = arith.constant 0 : i32
    return %c0_i32, %c0_i32_0 : i32, i32
  }
  func.func @transform_2(%arg0: i32) -> (i32, i32) {
    %c0_i32 = arith.constant 0 : i32
    %c0_i32_0 = arith.constant 0 : i32
    %c0_i32_1 = arith.constant 0 : i32
    return %c0_i32, %c0_i32_0 : i32, i32
  }
  func.func @transform_3(%arg0: i32) -> (i32, i32) {
    %c0_i32 = arith.constant 0 : i32
    %c0_i32_0 = arith.constant 0 : i32
    return %arg0, %c0_i32 : i32, i32
  }
}

module attributes {stable_mosaic.version = 11 : i64} {
  func.func @dpp_shared_g_kernel(%arg0: i32, %arg1: memref<32x32xf32, #tpu.memory_space<vmem>>, %arg2: memref<32x384xbf16, #tpu.memory_space<vmem>>, %arg3: memref<1x384xf32, #tpu.memory_space<vmem>>, %arg4: memref<32x128xf32, #tpu.memory_space<vmem>>) attributes {dimension_semantics = [#tpu.dimension_semantics<parallel>], iteration_bounds = array<i64: 2>, scalar_prefetch = 0 : i64, scratch_operands = 0 : i64, tpu.core_type = #tpu.core_type<tc>, window_params = [{transform_indices = @transform_0, window_bounds = array<i64: 32, 32>}, {pipeline_mode = #tpu.pipeline_mode<synchronous>, transform_indices = @transform_1, window_bounds = array<i64: 32, 384>}, {pipeline_mode = #tpu.pipeline_mode<synchronous>, transform_indices = @transform_2, window_bounds = array<i64: 1, 384>}, {transform_indices = @transform_3, window_bounds = array<i64: 32, 128>}]} {
    %c0 = arith.constant 0 : index
    %c0_0 = arith.constant 0 : index
    %0 = vector.load %arg1[%c0, %c0_0] : memref<32x32xf32, #tpu.memory_space<vmem>>, vector<32x32xf32>
    %1 = arith.truncf %0 : vector<32x32xf32> to vector<32x32xbf16>
    %c0_1 = arith.constant 0 : index
    %c0_2 = arith.constant 0 : index
    %2 = vector.load %arg2[%c0_1, %c0_2] : memref<32x384xbf16, #tpu.memory_space<vmem>>, vector<32x384xbf16>
    %cst = arith.constant dense<0.000000e+00> : vector<32x384xf32>
    %3 = tpu.matmul %1, %2, %cst {dimension_numbers = #tpu.dot_dimension_numbers<[1], [0], [0], [1], [0, 0, 1, 1], [], []>} : vector<32x32xbf16>, vector<32x384xbf16>, vector<32x384xf32> -> vector<32x384xf32>
    %c0_3 = arith.constant 0 : index
    %c0_4 = arith.constant 0 : index
    %4 = vector.load %arg3[%c0_3, %c0_4] : memref<1x384xf32, #tpu.memory_space<vmem>>, vector<1x384xf32>
    %5 = vector.broadcast %4 : vector<1x384xf32> to vector<32x384xf32>
    %6 = arith.addf %3, %5 : vector<32x384xf32>
    %7 = vector.extract_strided_slice %6 {offsets = [0, 0], sizes = [32, 128], strides = [1, 1]} : vector<32x384xf32> to vector<32x128xf32>
    %8 = vector.extract_strided_slice %6 {offsets = [0, 128], sizes = [32, 128], strides = [1, 1]} : vector<32x384xf32> to vector<32x128xf32>
    %9 = vector.extract_strided_slice %6 {offsets = [0, 256], sizes = [32, 128], strides = [1, 1]} : vector<32x384xf32> to vector<32x128xf32>
    %10 = arith.negf %9 : vector<32x128xf32>
    %11 = math.exp %10 : vector<32x128xf32>
    %cst_5 = arith.constant 1.000000e+00 : f32
    %12 = vector.broadcast %cst_5 : f32 to vector<32x128xf32>
    %13 = arith.addf %12, %11 : vector<32x128xf32>
    %14 = arith.divf %12, %13 : vector<32x128xf32>
    %15 = arith.mulf %14, %7 : vector<32x128xf32>
    %16 = arith.addf %8, %15 : vector<32x128xf32>
    %c0_6 = arith.constant 0 : index
    %c0_7 = arith.constant 0 : index
    %17 = vector.load %arg4[%c0_6, %c0_7] : memref<32x128xf32, #tpu.memory_space<vmem>>, vector<32x128xf32>
    tpu.vector_store %arg4[%c0_6, %c0_7], %16 {strides = array<i32>} : memref<32x128xf32, #tpu.memory_space<vmem>>, vector<32x128xf32>,
    return
  }
  func.func @transform_0(%arg0: i32) -> (i32, i32) {
    %c0_i32 = arith.constant 0 : i32
    %c0_i32_0 = arith.constant 0 : i32
    return %arg0, %c0_i32 : i32, i32
  }
  func.func @transform_1(%arg0: i32) -> (i32, i32) {
    %c0_i32 = arith.constant 0 : i32
    %c0_i32_0 = arith.constant 0 : i32
    %c0_i32_1 = arith.constant 0 : i32
    return %c0_i32, %c0_i32_0 : i32, i32
  }
  func.func @transform_2(%arg0: i32) -> (i32, i32) {
    %c0_i32 = arith.constant 0 : i32
    %c0_i32_0 = arith.constant 0 : i32
    %c0_i32_1 = arith.constant 0 : i32
    return %c0_i32, %c0_i32_0 : i32, i32
  }
  func.func @transform_3(%arg0: i32) -> (i32, i32) {
    %c0_i32 = arith.constant 0 : i32
    %c0_i32_0 = arith.constant 0 : i32
    return %arg0, %c0_i32 : i32, i32
  }
}

</mosaic_0001>

<bundles_post_ra>
// kernel: tpu_custom_call.1
= control target key start
LH: loop header
LB: loop body
LE: loop exit
PB: predicated region body
PF: predicated region fallthrough
CT: control target
= control target key end

     0   :  { %8 = vsyncpa [#allocation3], 0  ;;  %s777_s0 = inlined_call_operand.vmem [shape: f32[64,32], index: 0, kind: input, shape index: {}]   ;;  %s778_s1 = inlined_call_operand.vmem [shape: bf16[32,384], index: 1, kind: input, shape index: {}]   ;;  %s779_s2 = inlined_call_operand.vmem [shape: f32[1,384], index: 2, kind: input, shape index: {}]   ;;  %s780_s3 = inlined_call_operand.hbm [shape: f32[64,128], index: 3, kind: output, shape index: {}]  }
   0x1   :  { %10 = vsyncpa [#allocation3 + $0x1], 0  ;;  %s650_s12 = smov 0   ;;  %s652_s13 = smov 0  }
   0x2   :  { %s654_s14 = smov 0   ;;  %s656_s15 = smov 0  }
   0x3 LB: > { %s671_s16 = sadd.s32 4294967295, %s624_s15   ;;  %s457_s17 = sadd.s32 4294967294, %s624_s15   ;;  %s624_s15 = sphi %s656_s15, %s786_s15   ;;  %s620_s14 = sphi %s654_s14, %s785_s14   ;;  %s616_s13 = sphi %s652_s13, %s784_s13   ;;  %s612_s12 = sphi %s650_s12, %s783_s12  }
   0x4   : > { %s675_s18 = sadd.s32 1, %s624_s15   ;;  %s91_s19 = sadd.s32 1, %s620_s14 }
   0x5   : > { %s88_s20 = ssub.s32 %s624_s15, %s675_s18  ;;  %p101_p0 = scmp.ne.s32.totalorder %s620_s14, %s616_s13 }
   0x6   : > { %p89_p1 = scmp.eq.s32.totalorder %s88_s20, 0  ;;  %p102_p2 = scmp.eq.s32.totalorder %s671_s16, 1 }
   0x7   : > { %p107_p3 = scmp.ne.s32.totalorder %s616_s13, %s612_s12  ;;  %p108_p4 = scmp.eq.s32.totalorder %s457_s17, 1 }
   0x8   : > { %s686_s21 = scalar_select %p89_p1, %s620_s14, %s91_s19  }
   0x9   : > { %p688_p5 = por %p102_p2, %p101_p0  ;;  %p692_p6 = por %p108_p4, %p107_p3 }
   0xa   : > { %p460_p7 = scmp.ge.s32.totalorder %s624_s15, 1  ;;  %p141_p8 = scmp.lt.s32.totalorder %s624_s15, 3 }
   0xc   : > { %p142_p9 = pnand %p460_p7, %p141_p8 }
   0xd   : > { %v538_v0 = vld [vmem:[%s778_s1 + $0x8] ss:$12 sps:$4 sm:$0xff] (!%p142_p9)   ;;  %v539_v1 = vld [vmem:[%s778_s1 + $0x20] ss:$12 sps:$4 sm:$0xff] (!%p142_p9)   ;;  %s462_s28 = sshll.u32 (!%p142_p9), %s671_s16, 2  ;;  %v626_v6 = vmov (!%p142_p9), 0   ;;  %v189_v13 = vlaneseq (!%p142_p9) }
   0xe   : > { %145 = sbr.rel (%p142_p9) target bundleno = 290 (0x122), region = 32  ;;  %488 = vmatprep.subr.bf16.mxu1 (!%p142_p9), %v538_v0  ;;  %v540_v2 = vld [vmem:[%s778_s1 + $0x4] ss:$12 sps:$4 sm:$0xff] (!%p142_p9)   ;;  %p166_p10 = scmp.lt.s32.totalorder (!%p142_p9), %s462_s28, 7  ;;  %v542_v3 = vld [vmem:[%s778_s1] ss:$12 sps:$4 sm:$0xff] (!%p142_p9)   ;;  %275 = vmatprep.mubr.bf16.mxu0 (!%p142_p9), %v626_v6 }
   0xf   : > { %489 = vmatpush3.bf16.msra.mxu1 (!%p142_p9), %v538_v0  ;;  %243 = vmatprep.subr.bf16.mxu0 (!%p142_p9), %v540_v2  ;;  %v543_v4 = vld [vmem:[%s778_s1 + $0x1c] ss:$12 sps:$4 sm:$0xff] (!%p142_p9)   ;;  %v545_v5 = vld [vmem:[%s778_s1 + $0x18] ss:$12 sps:$4 sm:$0xff] (!%p142_p9)   ;;  %vm236_vm0 = vcmask (!%p142_p9), 261120   ;;  %v190_v14 = vshrl.u32 (!%p142_p9), %v189_v13, 7 }
  0x10   : > { %490 = vmatprep.subr.bf16.mxu1 (!%p142_p9), %v539_v1  ;;  %244 = vmatpush1.bf16.msra.mxu0 (!%p142_p9), %v542_v3  ;;  %v187_v16 = vld [vmem:[%s779_s2] sm:$0x7] (!%p142_p9)  ;;  %s162_s25 = sand.u32 (!%p142_p9), 1, %s616_s13   ;;  %s483_s29 = sshll.u32 (!%p142_p9), %s671_s16, 9 }
  0x11   : > { %245 = vmatprep.subr.bf16.mxu0 (!%p142_p9), %v543_v4  ;;  %v199_v15 = vsub.s32 (!%p142_p9), 2, %v190_v14  ;;  %v191_v46 = vsub.s32 (!%p142_p9), 0, %v190_v14  ;;  %v195_v47 = vsub.s32 (!%p142_p9), 1, %v190_v14  ;;  %s461_s26 = sshll.u32 (!%p142_p9), %s162_s25, 5  ;;  %s732_s16 = scalar_lea.hbm (!%p142_p9), %s780_s3, %s483_s29 }
  0x12   : > { %s164_s27 = scalar_lea.vmem (!%p142_p9), [#allocation2], %s461_s26  ;;  %s736_s5 = scalar_lea.sflag (!%p142_p9), [#allocation3], %s162_s25 }
  0x13   : > { %491 = vmatpush3.bf16.msra.mxu1 (!%p142_p9), %v539_v1  ;;  %v200_v17 = vrot.slane (!%p142_p9), %v187_v16, %v199_v15  ;;  %v192_v48 = vrot.slane (!%p142_p9), %v187_v16, %v191_v46  ;;  %v196_v49 = vrot.slane (!%p142_p9), %v187_v16, %v195_v47  ;;  %s627_s7 = smov (!%p142_p9), [#allocation2]  }
  0x14   : > { %246 = vmatpush1.bf16.msra.mxu0 (!%p142_p9), %v545_v5  ;;  %s566_s8 = sshll.u32 (!%p142_p9), %s627_s7, 4  ;;  %s567_s8 = int_to_ptr.vmem [resolvable:$false] %s566_s8 }
  0x15   : > { %s788_s28 = smov (!%p166_p10, %s462_s28), 7  ;;  %s568_s9 = scalar_lea.vmem %s567_s8, 1024 }
  0x16   : > { %s463_s10 = sshll.u32 %s788_s28, 3  ;;  %s395_s28 = sshll.u32 %s164_s27, 4  ;;  %s727_s28 = int_to_ptr.vmem [resolvable:$true] %s395_s28 }
  0x17   : > { %s169_s19 = scalar_lea.vmem %s777_s0, %s463_s10  ;;  %s562_s6 = scalar_lea.vmem %s727_s28, 512 }
  0x18   : > { %v173_v7 = vld [vmem:[%s169_s19] sm:$0xff]  ;;  %v174_v8 = vld [vmem:[%s169_s19 + $0x8] sm:$0xff]  ;;  %v175_v9 = vld [vmem:[%s169_s19 + $0x10] sm:$0xff]  ;;  %p563_p11 = scmp.ne.s32.totalorder %s727_s28, %s562_s6  ;;  %p569_p0 = scmp.lt.s32.totalorder %s727_s28, %s567_s8 }
  0x19   : > { %v177_v10 = vpack.c.bf16 %v174_v8, %v173_v7  ;;  %v176_v11 = vld [vmem:[%s169_s19 + $0x18] sm:$0xff]  ;;  %p570_p1 = scmp.lt.s32.totalorder %s568_s9, %s562_s6 }
  0x1a   : > { %v178_v12 = vpack.c.bf16 %v176_v11, %v175_v9  ;;  %p564_p12 = pnand %p563_p11, %p688_p5 }
  0x1b   : > { %492 = vmatprep.mubr.msk.bf16.mxu1 %vm236_vm0, %v177_v10  ;;  %470 = vmatmul.mubr.msk.bf16.vlgmr.msra.gmra.mrb[0].mxu0 %vm236_vm0, %v177_v10  ;;  %p571_p2 = por %p570_p1, %p569_p0 }
  0x1c   : > { %493 = vmatmul.mubr.msk.bf16.vlgmr.msra.gmra.mrb[0].mxu1 %vm236_vm0, %v178_v12  ;;  %285 = vmatprep.mubr.bf16.mxu0 %v626_v6  ;;  %p565_p13 = pneg %p564_p12 }
  0x1e   : > { %p572_p3 = pnand %p571_p2, %p565_p13 }
  0x23   : > { %471 = vmatmul.mubr.msk.bf16.gmra.mrb[4].mxu0 %vm236_vm0, %v178_v12 }
  0xee   : > { %v277_v18 = vpop.f32.mrb[0].mxu0 }
  0xef   : > { %v494_v19 = vpop.f32.mrb[0].mxu1  ;;  %v279_v20 = vpop.f32.mrb[1].mxu0  ;;  %v278_v54 = vadd.f32 %v277_v18, %v192_v48 }
  0xf0   : > { %v339_v21 = vadd.f32 %v494_v19, %v200_v17  ;;  %v330_v22 = vpop.f32.mrb[1].mxu1  ;;  %v281_v23 = vpop.f32.mrb[2].mxu0  ;;  %v280_v59 = vadd.f32 %v279_v20, %v196_v49 }
  0xf1   : > { %v331_v24 = vadd.f32 %v330_v22, %v200_v17  ;;  %v495_v25 = vpop.f32.mrb[2].mxu1  ;;  %v283_v26 = vpop.f32.mrb[3].mxu0  ;;  %v282_v60 = vadd.f32 %v281_v23, %v192_v48 }
  0xf2   : > { %v476_v27 = vmul.f32 -1.442695, %v339_v21  ;;  %v342_v28 = vadd.f32 %v495_v25, %v200_v17  ;;  %v333_v29 = vpop.f32.mrb[3].mxu1  ;;  %v284_v3 = vadd.f32 %v283_v26, %v196_v49 }
  0xf3   : > { %v474_v30 = vmul.f32 -1.442695, %v331_v24  ;;  %v334_v31 = vadd.f32 %v333_v29, %v200_v17 }
  0xf4   : > { %546 = vpow2.f32 %v476_v27  ;;  %v477_v32 = vmul.f32 -1.442695, %v342_v28 }
  0xf5   : > { %548 = vpow2.f32 %v474_v30  ;;  %v475_v33 = vmul.f32 -1.442695, %v334_v31 }
  0xf6   : > { %550 = vpow2.f32 %v477_v32  ;;  %v287_v34 = vpop.f32.mrb[4].mxu0 }
  0xf7   : > { %552 = vpow2.f32 %v475_v33  ;;  %v289_v35 = vpop.f32.mrb[5].mxu0  ;;  %v288_v50 = vadd.f32 %v287_v34, %v192_v48 }
  0xf8   : > { %v291_v36 = vpop.f32.mrb[6].mxu0  ;;  %v290_v51 = vadd.f32 %v289_v35, %v196_v49 }
  0xf9   : > { %v293_v37 = vpop.f32.mrb[7].mxu0  ;;  %v292_v52 = vadd.f32 %v291_v36, %v192_v48 }
  0xfa   : > { %v294_v0 = vadd.f32 %v293_v37, %v196_v49 }
  0xfe   : > { %v547_v38 = vpop.eup %546 }
  0xff   : > { %v549_v39 = vpop.eup %548  ;;  %v359_v40 = vadd.f32 1.0, %v547_v38 }
 0x100   : > { %v551_v41 = vpop.eup %550  ;;  %v357_v42 = vadd.f32 1.0, %v549_v39 }
 0x101   : > { %v553_v43 = vpop.eup %552  ;;  %554 = vrcp.f32 %v359_v40  ;;  %v360_v44 = vadd.f32 1.0, %v551_v41 }
 0x102   : > { %556 = vrcp.f32 %v357_v42  ;;  %v358_v45 = vadd.f32 1.0, %v553_v43 }
 0x103   : > { %558 = vrcp.f32 %v360_v44 }
 0x104   : > { %560 = vrcp.f32 %v358_v45 }
 0x10b   : > { %v555_v53 = vpop.eup %554 }
 0x10c   : > { %v557_v55 = vpop.eup %556  ;;  %v371_v56 = vmul.f32 %v555_v53, %v288_v50 }
 0x10d   : > { %v559_v57 = vpop.eup %558  ;;  %v369_v58 = vmul.f32 %v557_v55, %v278_v54 }
 0x10e   : > { %v561_v61 = vpop.eup %560  ;;  %v375_v62 = vadd.f32 %v371_v56, %v290_v51  ;;  %v372_v63 = vmul.f32 %v559_v57, %v292_v52 }
 0x10f   : > { %v373_v1 = vadd.f32 %v369_v58, %v280_v59  ;;  %v370_v2 = vmul.f32 %v561_v61, %v282_v60 }
 0x110   : > { %379 = vst [vmem:[%s164_s27 + $0x10] sm:$0xff] %v375_v62  ;;  %v376_v4 = vadd.f32 %v372_v63, %v294_v0 }
 0x111   : > { %377 = vst [vmem:[%s164_s27] sm:$0xff] %v373_v1  ;;  %v374_v5 = vadd.f32 %v370_v2, %v284_v3 }
 0x112   : > { %380 = vst [vmem:[%s164_s27 + $0x18] sm:$0xff] %v376_v4 }
 0x113   : > { %378 = vst [vmem:[%s164_s27 + $0x8] sm:$0xff] %v374_v5 }
 0x114   : > { %575 = shalt.err (!%p572_p3)
}
 0x115   : > { %s576_s10 = scalar_lea.hbm %s732_s16, 512  ;;  %s580_s19 = scalar_lea.hbm %s780_s3, 1024 }
 0x116   : > { %p577_p4 = scmp.ne.s32.totalorder %s732_s16, %s576_s10  ;;  %p581_p9 = scmp.lt.u32.totalorder %s732_s16, %s780_s3 }
 0x117   : > { %p582_p10 = scmp.lt.u32.totalorder %s580_s19, %s576_s10  ;;  %p584_p12 = scmp.lt.u32.totalorder %s576_s10, %s732_s16 }
 0x118   : > { %p578_p7 = pnand %p577_p4, %p688_p5 }
 0x119   : > { %p583_p11 = por %p582_p10, %p581_p9 }
 0x11a   : > { %p579_p8 = pneg %p578_p7 }
 0x11b   : > { %p585_p13 = por %p584_p12, %p583_p11 }
 0x11d   : > { %p586_p0 = pnand %p585_p13, %p579_p8 }
 0x11f   : > { %589 = shalt.err (!%p586_p0)
}
 0x120   : > { %s628_s25 = smov 128   ;;  %s629_s26 = smov 8  }
 0x121   : > { %496 = dma.vmem_to_hbm [thread:$0]  (%p688_p5), %s727_s28, 512, %s732_s16, %s736_s5, %s628_s25, %s628_s25, %s629_s26  }
 0x122 PF: > { %p502_p1 = scmp.ge.s32.totalorder %s624_s15, 2  ;;  %s410_s27 = sand.u32 1, %s612_s12  }
 0x123   : > { %s411_s29 = scalar_lea.sflag [#allocation3], %s410_s27 }
 0x124   : > { %p499_p2 = pnand %p502_p1, %p692_p6 }
 0x126   : > { %607 = dma.done.wait (!%p499_p2), %s411_s29, 512  }
 0x127   : > { %609 = vsyncadd (!%p499_p2), %s411_s29, 4294966784  ;;  %p13_p3 = scmp.ge.s32.totalorder %s675_s18, 4   ;;  %s783_s12 = smov %s616_s13 }
 0x128   : > { %s784_s13 = smov %s620_s14  ;;  %s785_s14 = smov %s686_s21 }
 0x129   : > { %s786_s15 = smov %s675_s18  ;;  %15 = sbr.rel (!%p13_p3) target bundleno = 3 (0x3), region = 67 }
 0x130   :  { %416 = vsyncpa [#allocation3], 1 }
 0x131   :  { %418 = vsyncpa [#allocation3 + $0x1], 1 }

// kernel: tpu_custom_call.1
= control target key start
LH: loop header
LB: loop body
LE: loop exit
PB: predicated region body
PF: predicated region fallthrough
CT: control target
= control target key end

     0   :  { %8 = vsyncpa [#allocation3], 0  ;;  %s777_s0 = inlined_call_operand.vmem [shape: f32[64,32], index: 0, kind: input, shape index: {}]   ;;  %s778_s1 = inlined_call_operand.vmem [shape: bf16[32,384], index: 1, kind: input, shape index: {}]   ;;  %s779_s2 = inlined_call_operand.vmem [shape: f32[1,384], index: 2, kind: input, shape index: {}]   ;;  %s780_s3 = inlined_call_operand.hbm [shape: f32[64,128], index: 3, kind: output, shape index: {}]  }
   0x1   :  { %10 = vsyncpa [#allocation3 + $0x1], 0  ;;  %s650_s12 = smov 0   ;;  %s652_s13 = smov 0  }
   0x2   :  { %s654_s14 = smov 0   ;;  %s656_s15 = smov 0  }
   0x3 LB: > { %s671_s16 = sadd.s32 4294967295, %s624_s15   ;;  %s457_s17 = sadd.s32 4294967294, %s624_s15   ;;  %s624_s15 = sphi %s656_s15, %s786_s15   ;;  %s620_s14 = sphi %s654_s14, %s785_s14   ;;  %s616_s13 = sphi %s652_s13, %s784_s13   ;;  %s612_s12 = sphi %s650_s12, %s783_s12  }
   0x4   : > { %s675_s18 = sadd.s32 1, %s624_s15   ;;  %s91_s19 = sadd.s32 1, %s620_s14 }
   0x5   : > { %s88_s20 = ssub.s32 %s624_s15, %s675_s18  ;;  %p101_p0 = scmp.ne.s32.totalorder %s620_s14, %s616_s13 }
   0x6   : > { %p89_p1 = scmp.eq.s32.totalorder %s88_s20, 0  ;;  %p102_p2 = scmp.eq.s32.totalorder %s671_s16, 1 }
   0x7   : > { %p107_p3 = scmp.ne.s32.totalorder %s616_s13, %s612_s12  ;;  %p108_p4 = scmp.eq.s32.totalorder %s457_s17, 1 }
   0x8   : > { %s686_s21 = scalar_select %p89_p1, %s620_s14, %s91_s19  }
   0x9   : > { %p688_p5 = por %p102_p2, %p101_p0  ;;  %p692_p6 = por %p108_p4, %p107_p3 }
   0xa   : > { %p460_p7 = scmp.ge.s32.totalorder %s624_s15, 1  ;;  %p141_p8 = scmp.lt.s32.totalorder %s624_s15, 3 }
   0xc   : > { %p142_p9 = pnand %p460_p7, %p141_p8 }
   0xd   : > { %v538_v0 = vld [vmem:[%s778_s1 + $0x8] ss:$12 sps:$4 sm:$0xff] (!%p142_p9)   ;;  %v539_v1 = vld [vmem:[%s778_s1 + $0x20] ss:$12 sps:$4 sm:$0xff] (!%p142_p9)   ;;  %s462_s28 = sshll.u32 (!%p142_p9), %s671_s16, 2  ;;  %v626_v6 = vmov (!%p142_p9), 0   ;;  %v189_v13 = vlaneseq (!%p142_p9) }
   0xe   : > { %145 = sbr.rel (%p142_p9) target bundleno = 290 (0x122), region = 32  ;;  %488 = vmatprep.subr.bf16.mxu1 (!%p142_p9), %v538_v0  ;;  %v540_v2 = vld [vmem:[%s778_s1 + $0x4] ss:$12 sps:$4 sm:$0xff] (!%p142_p9)   ;;  %p166_p10 = scmp.lt.s32.totalorder (!%p142_p9), %s462_s28, 7  ;;  %v542_v3 = vld [vmem:[%s778_s1] ss:$12 sps:$4 sm:$0xff] (!%p142_p9)   ;;  %275 = vmatprep.mubr.bf16.mxu0 (!%p142_p9), %v626_v6 }
   0xf   : > { %489 = vmatpush3.bf16.msra.mxu1 (!%p142_p9), %v538_v0  ;;  %243 = vmatprep.subr.bf16.mxu0 (!%p142_p9), %v540_v2  ;;  %v543_v4 = vld [vmem:[%s778_s1 + $0x1c] ss:$12 sps:$4 sm:$0xff] (!%p142_p9)   ;;  %v545_v5 = vld [vmem:[%s778_s1 + $0x18] ss:$12 sps:$4 sm:$0xff] (!%p142_p9)   ;;  %vm236_vm0 = vcmask (!%p142_p9), 261120   ;;  %v190_v14 = vshrl.u32 (!%p142_p9), %v189_v13, 7 }
  0x10   : > { %490 = vmatprep.subr.bf16.mxu1 (!%p142_p9), %v539_v1  ;;  %244 = vmatpush1.bf16.msra.mxu0 (!%p142_p9), %v542_v3  ;;  %v187_v16 = vld [vmem:[%s779_s2] sm:$0x7] (!%p142_p9)  ;;  %s162_s25 = sand.u32 (!%p142_p9), 1, %s616_s13   ;;  %s483_s29 = sshll.u32 (!%p142_p9), %s671_s16, 9 }
  0x11   : > { %245 = vmatprep.subr.bf16.mxu0 (!%p142_p9), %v543_v4  ;;  %v199_v15 = vsub.s32 (!%p142_p9), 2, %v190_v14  ;;  %v191_v46 = vsub.s32 (!%p142_p9), 0, %v190_v14  ;;  %v195_v47 = vsub.s32 (!%p142_p9), 1, %v190_v14  ;;  %s461_s26 = sshll.u32 (!%p142_p9), %s162_s25, 5  ;;  %s732_s16 = scalar_lea.hbm (!%p142_p9), %s780_s3, %s483_s29 }
  0x12   : > { %s164_s27 = scalar_lea.vmem (!%p142_p9), [#allocation2], %s461_s26  ;;  %s736_s5 = scalar_lea.sflag (!%p142_p9), [#allocation3], %s162_s25 }
  0x13   : > { %491 = vmatpush3.bf16.msra.mxu1 (!%p142_p9), %v539_v1  ;;  %v200_v17 = vrot.slane (!%p142_p9), %v187_v16, %v199_v15  ;;  %v192_v48 = vrot.slane (!%p142_p9), %v187_v16, %v191_v46  ;;  %v196_v49 = vrot.slane (!%p142_p9), %v187_v16, %v195_v47  ;;  %s627_s7 = smov (!%p142_p9), [#allocation2]  }
  0x14   : > { %246 = vmatpush1.bf16.msra.mxu0 (!%p142_p9), %v545_v5  ;;  %s566_s8 = sshll.u32 (!%p142_p9), %s627_s7, 4  ;;  %s567_s8 = int_to_ptr.vmem [resolvable:$false] %s566_s8 }
  0x15   : > { %s788_s28 = smov (!%p166_p10, %s462_s28), 7  ;;  %s568_s9 = scalar_lea.vmem %s567_s8, 1024 }
  0x16   : > { %s463_s10 = sshll.u32 %s788_s28, 3  ;;  %s395_s28 = sshll.u32 %s164_s27, 4  ;;  %s727_s28 = int_to_ptr.vmem [resolvable:$true] %s395_s28 }
  0x17   : > { %s169_s19 = scalar_lea.vmem %s777_s0, %s463_s10  ;;  %s562_s6 = scalar_lea.vmem %s727_s28, 512 }
  0x18   : > { %v173_v7 = vld [vmem:[%s169_s19] sm:$0xff]  ;;  %v174_v8 = vld [vmem:[%s169_s19 + $0x8] sm:$0xff]  ;;  %v175_v9 = vld [vmem:[%s169_s19 + $0x10] sm:$0xff]  ;;  %p563_p11 = scmp.ne.s32.totalorder %s727_s28, %s562_s6  ;;  %p569_p0 = scmp.lt.s32.totalorder %s727_s28, %s567_s8 }
  0x19   : > { %v177_v10 = vpack.c.bf16 %v174_v8, %v173_v7  ;;  %v176_v11 = vld [vmem:[%s169_s19 + $0x18] sm:$0xff]  ;;  %p570_p1 = scmp.lt.s32.totalorder %s568_s9, %s562_s6 }
  0x1a   : > { %v178_v12 = vpack.c.bf16 %v176_v11, %v175_v9  ;;  %p564_p12 = pnand %p563_p11, %p688_p5 }
  0x1b   : > { %492 = vmatprep.mubr.msk.bf16.mxu1 %vm236_vm0, %v177_v10  ;;  %470 = vmatmul.mubr.msk.bf16.vlgmr.msra.gmra.mrb[0].mxu0 %vm236_vm0, %v177_v10  ;;  %p571_p2 = por %p570_p1, %p569_p0 }
  0x1c   : > { %493 = vmatmul.mubr.msk.bf16.vlgmr.msra.gmra.mrb[0].mxu1 %vm236_vm0, %v178_v12  ;;  %285 = vmatprep.mubr.bf16.mxu0 %v626_v6  ;;  %p565_p13 = pneg %p564_p12 }
  0x1e   : > { %p572_p3 = pnand %p571_p2, %p565_p13 }
  0x23   : > { %471 = vmatmul.mubr.msk.bf16.gmra.mrb[4].mxu0 %vm236_vm0, %v178_v12 }
  0xee   : > { %v277_v18 = vpop.f32.mrb[0].mxu0 }
  0xef   : > { %v494_v19 = vpop.f32.mrb[0].mxu1  ;;  %v279_v20 = vpop.f32.mrb[1].mxu0  ;;  %v278_v54 = vadd.f32 %v277_v18, %v192_v48 }
  0xf0   : > { %v339_v21 = vadd.f32 %v494_v19, %v200_v17  ;;  %v330_v22 = vpop.f32.mrb[1].mxu1  ;;  %v281_v23 = vpop.f32.mrb[2].mxu0  ;;  %v280_v59 = vadd.f32 %v279_v20, %v196_v49 }
  0xf1   : > { %v331_v24 = vadd.f32 %v330_v22, %v200_v17  ;;  %v495_v25 = vpop.f32.mrb[2].mxu1  ;;  %v283_v26 = vpop.f32.mrb[3].mxu0  ;;  %v282_v60 = vadd.f32 %v281_v23, %v192_v48 }
  0xf2   : > { %v476_v27 = vmul.f32 -1.442695, %v339_v21  ;;  %v342_v28 = vadd.f32 %v495_v25, %v200_v17  ;;  %v333_v29 = vpop.f32.mrb[3].mxu1  ;;  %v284_v3 = vadd.f32 %v283_v26, %v196_v49 }
  0xf3   : > { %v474_v30 = vmul.f32 -1.442695, %v331_v24  ;;  %v334_v31 = vadd.f32 %v333_v29, %v200_v17 }
  0xf4   : > { %546 = vpow2.f32 %v476_v27  ;;  %v477_v32 = vmul.f32 -1.442695, %v342_v28 }
  0xf5   : > { %548 = vpow2.f32 %v474_v30  ;;  %v475_v33 = vmul.f32 -1.442695, %v334_v31 }
  0xf6   : > { %550 = vpow2.f32 %v477_v32  ;;  %v287_v34 = vpop.f32.mrb[4].mxu0 }
  0xf7   : > { %552 = vpow2.f32 %v475_v33  ;;  %v289_v35 = vpop.f32.mrb[5].mxu0  ;;  %v288_v50 = vadd.f32 %v287_v34, %v192_v48 }
  0xf8   : > { %v291_v36 = vpop.f32.mrb[6].mxu0  ;;  %v290_v51 = vadd.f32 %v289_v35, %v196_v49 }
  0xf9   : > { %v293_v37 = vpop.f32.mrb[7].mxu0  ;;  %v292_v52 = vadd.f32 %v291_v36, %v192_v48 }
  0xfa   : > { %v294_v0 = vadd.f32 %v293_v37, %v196_v49 }
  0xfe   : > { %v547_v38 = vpop.eup %546 }
  0xff   : > { %v549_v39 = vpop.eup %548  ;;  %v359_v40 = vadd.f32 1.0, %v547_v38 }
 0x100   : > { %v551_v41 = vpop.eup %550  ;;  %v357_v42 = vadd.f32 1.0, %v549_v39 }
 0x101   : > { %v553_v43 = vpop.eup %552  ;;  %554 = vrcp.f32 %v359_v40  ;;  %v360_v44 = vadd.f32 1.0, %v551_v41 }
 0x102   : > { %556 = vrcp.f32 %v357_v42  ;;  %v358_v45 = vadd.f32 1.0, %v553_v43 }
 0x103   : > { %558 = vrcp.f32 %v360_v44 }
 0x104   : > { %560 = vrcp.f32 %v358_v45 }
 0x10b   : > { %v555_v53 = vpop.eup %554 }
 0x10c   : > { %v557_v55 = vpop.eup %556  ;;  %v371_v56 = vmul.f32 %v555_v53, %v288_v50 }
 0x10d   : > { %v559_v57 = vpop.eup %558  ;;  %v369_v58 = vmul.f32 %v557_v55, %v278_v54 }
 0x10e   : > { %v561_v61 = vpop.eup %560  ;;  %v375_v62 = vadd.f32 %v371_v56, %v290_v51  ;;  %v372_v63 = vmul.f32 %v559_v57, %v292_v52 }
 0x10f   : > { %v373_v1 = vadd.f32 %v369_v58, %v280_v59  ;;  %v370_v2 = vmul.f32 %v561_v61, %v282_v60 }
 0x110   : > { %379 = vst [vmem:[%s164_s27 + $0x10] sm:$0xff] %v375_v62  ;;  %v376_v4 = vadd.f32 %v372_v63, %v294_v0 }
 0x111   : > { %377 = vst [vmem:[%s164_s27] sm:$0xff] %v373_v1  ;;  %v374_v5 = vadd.f32 %v370_v2, %v284_v3 }
 0x112   : > { %380 = vst [vmem:[%s164_s27 + $0x18] sm:$0xff] %v376_v4 }
 0x113   : > { %378 = vst [vmem:[%s164_s27 + $0x8] sm:$0xff] %v374_v5 }
 0x114   : > { %575 = shalt.err (!%p572_p3)
}
 0x115   : > { %s576_s10 = scalar_lea.hbm %s732_s16, 512  ;;  %s580_s19 = scalar_lea.hbm %s780_s3, 1024 }
 0x116   : > { %p577_p4 = scmp.ne.s32.totalorder %s732_s16, %s576_s10  ;;  %p581_p9 = scmp.lt.u32.totalorder %s732_s16, %s780_s3 }
 0x117   : > { %p582_p10 = scmp.lt.u32.totalorder %s580_s19, %s576_s10  ;;  %p584_p12 = scmp.lt.u32.totalorder %s576_s10, %s732_s16 }
 0x118   : > { %p578_p7 = pnand %p577_p4, %p688_p5 }
 0x119   : > { %p583_p11 = por %p582_p10, %p581_p9 }
 0x11a   : > { %p579_p8 = pneg %p578_p7 }
 0x11b   : > { %p585_p13 = por %p584_p12, %p583_p11 }
 0x11d   : > { %p586_p0 = pnand %p585_p13, %p579_p8 }
 0x11f   : > { %589 = shalt.err (!%p586_p0)
}
 0x120   : > { %s628_s25 = smov 128   ;;  %s629_s26 = smov 8  }
 0x121   : > { %496 = dma.vmem_to_hbm [thread:$0]  (%p688_p5), %s727_s28, 512, %s732_s16, %s736_s5, %s628_s25, %s628_s25, %s629_s26  }
 0x122 PF: > { %p502_p1 = scmp.ge.s32.totalorder %s624_s15, 2  ;;  %s410_s27 = sand.u32 1, %s612_s12  }
 0x123   : > { %s411_s29 = scalar_lea.sflag [#allocation3], %s410_s27 }
 0x124   : > { %p499_p2 = pnand %p502_p1, %p692_p6 }
 0x126   : > { %607 = dma.done.wait (!%p499_p2), %s411_s29, 512  }
 0x127   : > { %609 = vsyncadd (!%p499_p2), %s411_s29, 4294966784  ;;  %p13_p3 = scmp.ge.s32.totalorder %s675_s18, 4   ;;  %s783_s12 = smov %s616_s13 }
 0x128   : > { %s784_s13 = smov %s620_s14  ;;  %s785_s14 = smov %s686_s21 }
 0x129   : > { %s786_s15 = smov %s675_s18  ;;  %15 = sbr.rel (!%p13_p3) target bundleno = 3 (0x3), region = 67 }
 0x130   :  { %416 = vsyncpa [#allocation3], 1 }
 0x131   :  { %418 = vsyncpa [#allocation3 + $0x1], 1 }

</bundles_post_ra>
